<compile_context>
chip_gen: v6e
topology: v6e:2x2x1
jax: 0.10.0
libtpu: 0.0.40
codegen_flags: <defaults>
</compile_context>

<pallas_src>
import functools

import jax
import jax.numpy as jnp
from jax.experimental import pallas as pl
from jax.experimental.pallas import tpu as pltpu


C_PAD = 32      # all layer widths (1, 16, 32, 16, 1) zero-padded to this lane width
N_LAYERS = 4


# ----------------------------------------------------------------------------
# Fused Pallas kernel: 4 SplineConv layers + ReLU/ReLU/ReLU/Tanh in one body
# ----------------------------------------------------------------------------
def fused_spline_gnn_kernel(a_cat_ref, x_ref, w_ref, b_ref, o_ref, *, K, N, C, L):
    # a_cat_ref : (N, (K+1)*N) bf16  [A_0 | ... | A_{K-1} | I], mean-normalized
    # x_ref     : (N, 1)       f32   raw node features (batch-major flat input)
    # w_ref     : (L, C, (K+1)*C) f32 wide-packed spline weights; slot K = root
    # b_ref     : (L, 1, C)    f32   per-layer bias (zero-padded)
    # o_ref     : (N, 1)       f32   final tanh output, channel 0
    x = x_ref[...]                                   # (N, 1) f32

    for layer in range(L):                           # static unroll; VMEM-resident
        if layer == 0:
            # cin == 1 -> the per-basis transform is an outer product: pure VPU,
            # no MXU pushes for layer 0.
            y_wide = x * w_ref[0, 0:1, :]            # (N, (K+1)*C)
        else:
            # Single wide transform matmul: one MXU push for all K+1 bases.
            y_wide = jnp.dot(x, w_ref[layer],
                             preferred_element_type=jnp.float32)
        y_wide = y_wide.astype(jnp.bfloat16)
        # Restack (N, (K+1)*C) -> ((K+1)*N, C) so the basis index joins the
        # contraction (sublane) axis: static lane slices + sublane concat
        # (relayout only; keeps the MXU chain at 2 pushes per layer).
        y_stack = jnp.concatenate(
            [y_wide[:, k * C:(k + 1) * C] for k in range(K + 1)], axis=0)
        # Single wide aggregation matmul, contraction depth (K+1)*N; the
        # identity block of A_cat folds the root term in.  bf16 x bf16 -> f32.
        acc = jnp.dot(a_cat_ref[...], y_stack,
                      preferred_element_type=jnp.float32) + b_ref[layer]
        if layer < L - 1:
            x = jnp.maximum(acc, 0.0)                # f32 ReLU, padding stays 0
        else:
            # Only the live output channel goes through tanh (32 EUP evals).
            o_ref[...] = jnp.tanh(acc[:, :1])        # the only narrow store


def fused_spline_gnn(A_cat, x_flat, W_wide, b_pack, *, K, N, C, L):
    kernel = functools.partial(fused_spline_gnn_kernel, K=K, N=N, C=C, L=L)
    vmem = pl.BlockSpec(memory_space=pltpu.MemorySpace.VMEM)
    flops = ((L - 1) * 2 * N * C * (K + 1) * C        # wide transform matmuls
             + N * (K + 1) * C                        # layer-0 outer product
             + L * 2 * N * ((K + 1) * N) * C)         # aggregation matmuls
    bytes_accessed = int(A_cat.size * A_cat.dtype.itemsize
                         + 4 * (x_flat.size + W_wide.size + b_pack.size + N))
    return pl.pallas_call(
        kernel,
        out_shape=jax.ShapeDtypeStruct((N, 1), jnp.float32),
        in_specs=[vmem, vmem, vmem, vmem],
        out_specs=vmem,
        cost_estimate=pl.CostEstimate(
            flops=flops, transcendentals=N, bytes_accessed=bytes_accessed),
    )(A_cat, x_flat, W_wide, b_pack)


# ----------------------------------------------------------------------------
# JAX glue: dense per-basis aggregation matrices from (edges, pseudo)
# (open B-spline, degree=1, dim=1, kernel_size=K, aggr='mean' — SplineConv
#  defaults for SplineConv(cin, cout, 1, 6))
# ----------------------------------------------------------------------------
def build_basis_adjacency(edge_index, pseudo, N, K):
    src = edge_index[0]            # message source j
    dst = edge_index[1]            # message target i
    pos = jnp.clip(pseudo, 0.0, 1.0) * (K - 1)
    idx0 = jnp.clip(jnp.floor(pos).astype(jnp.int32), 0, K - 1)
    frac = pos - idx0.astype(pos.dtype)
    idx1 = jnp.minimum(idx0 + 1, K - 1)

    A = jnp.zeros((K, N, N), jnp.float32)
    A = A.at[idx0, dst, src].add(1.0 - frac)
    A = A.at[idx1, dst, src].add(frac)

    deg = jnp.zeros((N,), jnp.float32).at[dst].add(1.0)
    deg = jnp.maximum(deg, 1.0)
    return A / deg[None, :, None]


def pack_operands(A, params, K, N, C):
    """Build bf16 A_cat = [A_0|...|A_{K-1}|I] and wide-packed f32 weights/biases."""
    A_cat = jnp.concatenate(
        [A.transpose(1, 0, 2).reshape(N, K * N), jnp.eye(N, dtype=jnp.float32)],
        axis=1).astype(jnp.bfloat16)                         # (N, (K+1)*N)
    L = len(params)
    W_wide = jnp.zeros((L, C, (K + 1) * C), jnp.float32)     # hconcat of W_k
    b_pack = jnp.zeros((L, 1, C), jnp.float32)
    for l, (W, Wr, b) in enumerate(params):
        cin, cout = Wr.shape
        for k in range(K):
            W_wide = W_wide.at[l, :cin, k * C:k * C + cout].set(W[k])
        W_wide = W_wide.at[l, :cin, K * C:K * C + cout].set(Wr)   # root slot K
        b_pack = b_pack.at[l, 0, :cout].set(b)
    return A_cat, W_wide, b_pack


# ----------------------------------------------------------------------------
# APModel2.forward equivalent
# ----------------------------------------------------------------------------
@functools.partial(jax.jit, static_argnames=("batch_size", "dimD", "K"))
def apmodel2_forward(y, A_cat, W_wide, b_pack, *, batch_size, dimD, K):
    N = batch_size * dimD
    C = b_pack.shape[-1]
    L = W_wide.shape[0]
    # u = t(y[:, :dimD]); u1 = flatten(t(u)).unsqueeze(0); x = t(u1) -> (N, 1) batch-major
    x_flat = y[:, :dimD].astype(jnp.float32).reshape(N, 1)
    out = fused_spline_gnn(A_cat, x_flat, W_wide, b_pack, K=K, N=N, C=C, L=L)  # (N, 1)
    # Reference epilogue: unflatten dim0 -> (dimD, batch, 1), squeeze, transpose.
    return out.reshape(dimD, batch_size).T                   # (batch_size, dimD)


# ----------------------------------------------------------------------------
# main
# ----------------------------------------------------------------------------
if __name__ == "__main__":
    batch_size, dimD = 2, 16
    K = 6                               # kernel_size of every SplineConv
    N = batch_size * dimD
    C = C_PAD

    key = jax.random.PRNGKey(0)
    k_pseudo, k_y, *w_keys = jax.random.split(key, 2 + 8)

    # base graph for one sample: bidirectional ring over dimD nodes
    s = jnp.arange(dimD, dtype=jnp.int32)
    d = (s + 1) % dimD
    edges = jnp.stack([jnp.concatenate([s, d]), jnp.concatenate([d, s])])  # (2, E)
    E = edges.shape[1]
    pseudo = jax.random.uniform(k_pseudo, (E,), minval=0.0, maxval=0.999)

    # APModel2.expand: shift node ids by dimD per batch element, repeat pseudo
    exp_edges = jnp.concatenate(
        [edges + b * dimD for b in range(batch_size)], axis=1)
    exp_pseudo = jnp.concatenate([pseudo] * batch_size, axis=0)

    A = build_basis_adjacency(exp_edges, exp_pseudo, N, K)     # (K, N, N)

    # SplineConv(1,16,1,6) -> (16,32) -> (32,16) -> (16,1): xavier-uniform spline
    # and root weights, zero bias (as in initialize_weights()).
    chans = [1, 16, 32, 16, 1]
    params = []
    for i in range(N_LAYERS):
        cin, cout = chans[i], chans[i + 1]
        limit = (6.0 / (cin * K + cout)) ** 0.5
        W = jax.random.uniform(w_keys[2 * i], (K, cin, cout),
                               minval=-limit, maxval=limit, dtype=jnp.float32)
        Wr = jax.random.uniform(w_keys[2 * i + 1], (cin, cout),
                                minval=-limit, maxval=limit, dtype=jnp.float32)
        b = jnp.zeros((cout,), jnp.float32)
        params.append((W, Wr, b))

    A_cat, W_wide, b_pack = pack_operands(A, params, K, N, C)

    # forward input y : (batch_size, dimD)
    y = jax.random.normal(k_y, (batch_size, dimD), dtype=jnp.float32)

    out = apmodel2_forward(y, A_cat, W_wide, b_pack,
                           batch_size=batch_size, dimD=dimD, K=K)
    out = jax.block_until_ready(out)
    assert out.shape == (batch_size, dimD)
    print("KERNEL_OK")
</pallas_src>

<mosaic_0001>
module attributes {stable_mosaic.version = 11 : i64} {
  func.func @fused_spline_gnn_kernel(%arg0: memref<32x224xbf16, #tpu.memory_space<vmem>>, %arg1: memref<32x1xf32, #tpu.memory_space<vmem>>, %arg2: memref<4x32x224xf32, #tpu.memory_space<vmem>>, %arg3: memref<4x1x32xf32, #tpu.memory_space<vmem>>, %arg4: memref<32x1xf32, #tpu.memory_space<vmem>>) attributes {dimension_semantics = [], scalar_prefetch = 0 : i64, scratch_operands = 0 : i64, tpu.core_type = #tpu.core_type<tc>} {
    %c0 = arith.constant 0 : index
    %c0_0 = arith.constant 0 : index
    %0 = vector.load %arg1[%c0, %c0_0] : memref<32x1xf32, #tpu.memory_space<vmem>>, vector<32x1xf32>
    %c0_1 = arith.constant 0 : index
    %c0_2 = arith.constant 0 : index
    %c0_3 = arith.constant 0 : index
    %1 = vector.load %arg2[%c0_1, %c0_2, %c0_3] : memref<4x32x224xf32, #tpu.memory_space<vmem>>, vector<1x1x224xf32>
    %2 = vector.shape_cast %1 : vector<1x1x224xf32> to vector<1x224xf32>
    %3 = vector.broadcast %0 : vector<32x1xf32> to vector<32x224xf32>
    %4 = vector.broadcast %2 : vector<1x224xf32> to vector<32x224xf32>
    %5 = arith.mulf %3, %4 : vector<32x224xf32>
    %6 = arith.truncf %5 : vector<32x224xf32> to vector<32x224xbf16>
    %7 = vector.extract_strided_slice %6 {offsets = [0, 0], sizes = [32, 32], strides = [1, 1]} : vector<32x224xbf16> to vector<32x32xbf16>
    %8 = vector.extract_strided_slice %6 {offsets = [0, 32], sizes = [32, 32], strides = [1, 1]} : vector<32x224xbf16> to vector<32x32xbf16>
    %9 = vector.extract_strided_slice %6 {offsets = [0, 64], sizes = [32, 32], strides = [1, 1]} : vector<32x224xbf16> to vector<32x32xbf16>
    %10 = vector.extract_strided_slice %6 {offsets = [0, 96], sizes = [32, 32], strides = [1, 1]} : vector<32x224xbf16> to vector<32x32xbf16>
    %11 = vector.extract_strided_slice %6 {offsets = [0, 128], sizes = [32, 32], strides = [1, 1]} : vector<32x224xbf16> to vector<32x32xbf16>
    %12 = vector.extract_strided_slice %6 {offsets = [0, 160], sizes = [32, 32], strides = [1, 1]} : vector<32x224xbf16> to vector<32x32xbf16>
    %13 = vector.extract_strided_slice %6 {offsets = [0, 192], sizes = [32, 32], strides = [1, 1]} : vector<32x224xbf16> to vector<32x32xbf16>
    %14 = tpu.concatenate %7, %8, %9, %10, %11, %12, %13 in 0 : vector<32x32xbf16>, vector<32x32xbf16>, vector<32x32xbf16>, vector<32x32xbf16>, vector<32x32xbf16>, vector<32x32xbf16>, vector<32x32xbf16> -> vector<224x32xbf16>
    %c0_4 = arith.constant 0 : index
    %c0_5 = arith.constant 0 : index
    %15 = vector.load %arg0[%c0_4, %c0_5] : memref<32x224xbf16, #tpu.memory_space<vmem>>, vector<32x224xbf16>
    %cst = arith.constant dense<0.000000e+00> : vector<32x32xf32>
    %16 = tpu.matmul %15, %14, %cst {dimension_numbers = #tpu.dot_dimension_numbers<[1], [0], [0], [1], [0, 0, 1, 1], [], []>} : vector<32x224xbf16>, vector<224x32xbf16>, vector<32x32xf32> -> vector<32x32xf32>
    %c0_6 = arith.constant 0 : index
    %c0_7 = arith.constant 0 : index
    %c0_8 = arith.constant 0 : index
    %17 = vector.load %arg3[%c0_6, %c0_7, %c0_8] : memref<4x1x32xf32, #tpu.memory_space<vmem>>, vector<1x1x32xf32>
    %18 = vector.shape_cast %17 : vector<1x1x32xf32> to vector<1x32xf32>
    %19 = vector.broadcast %18 : vector<1x32xf32> to vector<32x32xf32>
    %20 = arith.addf %16, %19 : vector<32x32xf32>
    %cst_9 = arith.constant 0.000000e+00 : f32
    %21 = vector.broadcast %cst_9 : f32 to vector<32x32xf32>
    %22 = arith.maximumf %20, %21 : vector<32x32xf32>
    %c1 = arith.constant 1 : index
    %c0_10 = arith.constant 0 : index
    %c0_11 = arith.constant 0 : index
    %23 = vector.load %arg2[%c1, %c0_10, %c0_11] : memref<4x32x224xf32, #tpu.memory_space<vmem>>, vector<1x32x224xf32>
    %24 = vector.shape_cast %23 : vector<1x32x224xf32> to vector<32x224xf32>
    %cst_12 = arith.constant dense<0.000000e+00> : vector<32x224xf32>
    %25 = tpu.matmul %22, %24, %cst_12 {dimension_numbers = #tpu.dot_dimension_numbers<[1], [0], [0], [1], [0, 0, 1, 1], [], []>} : vector<32x32xf32>, vector<32x224xf32>, vector<32x224xf32> -> vector<32x224xf32>
    %26 = arith.truncf %25 : vector<32x224xf32> to vector<32x224xbf16>
    %27 = vector.extract_strided_slice %26 {offsets = [0, 0], sizes = [32, 32], strides = [1, 1]} : vector<32x224xbf16> to vector<32x32xbf16>
    %28 = vector.extract_strided_slice %26 {offsets = [0, 32], sizes = [32, 32], strides = [1, 1]} : vector<32x224xbf16> to vector<32x32xbf16>
    %29 = vector.extract_strided_slice %26 {offsets = [0, 64], sizes = [32, 32], strides = [1, 1]} : vector<32x224xbf16> to vector<32x32xbf16>
    %30 = vector.extract_strided_slice %26 {offsets = [0, 96], sizes = [32, 32], strides = [1, 1]} : vector<32x224xbf16> to vector<32x32xbf16>
    %31 = vector.extract_strided_slice %26 {offsets = [0, 128], sizes = [32, 32], strides = [1, 1]} : vector<32x224xbf16> to vector<32x32xbf16>
    %32 = vector.extract_strided_slice %26 {offsets = [0, 160], sizes = [32, 32], strides = [1, 1]} : vector<32x224xbf16> to vector<32x32xbf16>
    %33 = vector.extract_strided_slice %26 {offsets = [0, 192], sizes = [32, 32], strides = [1, 1]} : vector<32x224xbf16> to vector<32x32xbf16>
    %34 = tpu.concatenate %27, %28, %29, %30, %31, %32, %33 in 0 : vector<32x32xbf16>, vector<32x32xbf16>, vector<32x32xbf16>, vector<32x32xbf16>, vector<32x32xbf16>, vector<32x32xbf16>, vector<32x32xbf16> -> vector<224x32xbf16>
    %c0_13 = arith.constant 0 : index
    %c0_14 = arith.constant 0 : index
    %35 = vector.load %arg0[%c0_13, %c0_14] : memref<32x224xbf16, #tpu.memory_space<vmem>>, vector<32x224xbf16>
    %cst_15 = arith.constant dense<0.000000e+00> : vector<32x32xf32>
    %36 = tpu.matmul %35, %34, %cst_15 {dimension_numbers = #tpu.dot_dimension_numbers<[1], [0], [0], [1], [0, 0, 1, 1], [], []>} : vector<32x224xbf16>, vector<224x32xbf16>, vector<32x32xf32> -> vector<32x32xf32>
    %c1_16 = arith.constant 1 : index
    %c0_17 = arith.constant 0 : index
    %c0_18 = arith.constant 0 : index
    %37 = vector.load %arg3[%c1_16, %c0_17, %c0_18] : memref<4x1x32xf32, #tpu.memory_space<vmem>>, vector<1x1x32xf32>
    %38 = vector.shape_cast %37 : vector<1x1x32xf32> to vector<1x32xf32>
    %39 = vector.broadcast %38 : vector<1x32xf32> to vector<32x32xf32>
    %40 = arith.addf %36, %39 : vector<32x32xf32>
    %cst_19 = arith.constant 0.000000e+00 : f32
    %41 = vector.broadcast %cst_19 : f32 to vector<32x32xf32>
    %42 = arith.maximumf %40, %41 : vector<32x32xf32>
    %c2 = arith.constant 2 : index
    %c0_20 = arith.constant 0 : index
    %c0_21 = arith.constant 0 : index
    %43 = vector.load %arg2[%c2, %c0_20, %c0_21] : memref<4x32x224xf32, #tpu.memory_space<vmem>>, vector<1x32x224xf32>
    %44 = vector.shape_cast %43 : vector<1x32x224xf32> to vector<32x224xf32>
    %cst_22 = arith.constant dense<0.000000e+00> : vector<32x224xf32>
    %45 = tpu.matmul %42, %44, %cst_22 {dimension_numbers = #tpu.dot_dimension_numbers<[1], [0], [0], [1], [0, 0, 1, 1], [], []>} : vector<32x32xf32>, vector<32x224xf32>, vector<32x224xf32> -> vector<32x224xf32>
    %46 = arith.truncf %45 : vector<32x224xf32> to vector<32x224xbf16>
    %47 = vector.extract_strided_slice %46 {offsets = [0, 0], sizes = [32, 32], strides = [1, 1]} : vector<32x224xbf16> to vector<32x32xbf16>
    %48 = vector.extract_strided_slice %46 {offsets = [0, 32], sizes = [32, 32], strides = [1, 1]} : vector<32x224xbf16> to vector<32x32xbf16>
    %49 = vector.extract_strided_slice %46 {offsets = [0, 64], sizes = [32, 32], strides = [1, 1]} : vector<32x224xbf16> to vector<32x32xbf16>
    %50 = vector.extract_strided_slice %46 {offsets = [0, 96], sizes = [32, 32], strides = [1, 1]} : vector<32x224xbf16> to vector<32x32xbf16>
    %51 = vector.extract_strided_slice %46 {offsets = [0, 128], sizes = [32, 32], strides = [1, 1]} : vector<32x224xbf16> to vector<32x32xbf16>
    %52 = vector.extract_strided_slice %46 {offsets = [0, 160], sizes = [32, 32], strides = [1, 1]} : vector<32x224xbf16> to vector<32x32xbf16>
    %53 = vector.extract_strided_slice %46 {offsets = [0, 192], sizes = [32, 32], strides = [1, 1]} : vector<32x224xbf16> to vector<32x32xbf16>
    %54 = tpu.concatenate %47, %48, %49, %50, %51, %52, %53 in 0 : vector<32x32xbf16>, vector<32x32xbf16>, vector<32x32xbf16>, vector<32x32xbf16>, vector<32x32xbf16>, vector<32x32xbf16>, vector<32x32xbf16> -> vector<224x32xbf16>
    %c0_23 = arith.constant 0 : index
    %c0_24 = arith.constant 0 : index
    %55 = vector.load %arg0[%c0_23, %c0_24] : memref<32x224xbf16, #tpu.memory_space<vmem>>, vector<32x224xbf16>
    %cst_25 = arith.constant dense<0.000000e+00> : vector<32x32xf32>
    %56 = tpu.matmul %55, %54, %cst_25 {dimension_numbers = #tpu.dot_dimension_numbers<[1], [0], [0], [1], [0, 0, 1, 1], [], []>} : vector<32x224xbf16>, vector<224x32xbf16>, vector<32x32xf32> -> vector<32x32xf32>
    %c2_26 = arith.constant 2 : index
    %c0_27 = arith.constant 0 : index
    %c0_28 = arith.constant 0 : index
    %57 = vector.load %arg3[%c2_26, %c0_27, %c0_28] : memref<4x1x32xf32, #tpu.memory_space<vmem>>, vector<1x1x32xf32>
    %58 = vector.shape_cast %57 : vector<1x1x32xf32> to vector<1x32xf32>
    %59 = vector.broadcast %58 : vector<1x32xf32> to vector<32x32xf32>
    %60 = arith.addf %56, %59 : vector<32x32xf32>
    %cst_29 = arith.constant 0.000000e+00 : f32
    %61 = vector.broadcast %cst_29 : f32 to vector<32x32xf32>
    %62 = arith.maximumf %60, %61 : vector<32x32xf32>
    %c3 = arith.constant 3 : index
    %c0_30 = arith.constant 0 : index
    %c0_31 = arith.constant 0 : index
    %63 = vector.load %arg2[%c3, %c0_30, %c0_31] : memref<4x32x224xf32, #tpu.memory_space<vmem>>, vector<1x32x224xf32>
    %64 = vector.shape_cast %63 : vector<1x32x224xf32> to vector<32x224xf32>
    %cst_32 = arith.constant dense<0.000000e+00> : vector<32x224xf32>
    %65 = tpu.matmul %62, %64, %cst_32 {dimension_numbers = #tpu.dot_dimension_numbers<[1], [0], [0], [1], [0, 0, 1, 1], [], []>} : vector<32x32xf32>, vector<32x224xf32>, vector<32x224xf32> -> vector<32x224xf32>
    %66 = arith.truncf %65 : vector<32x224xf32> to vector<32x224xbf16>
    %67 = vector.extract_strided_slice %66 {offsets = [0, 0], sizes = [32, 32], strides = [1, 1]} : vector<32x224xbf16> to vector<32x32xbf16>
    %68 = vector.extract_strided_slice %66 {offsets = [0, 32], sizes = [32, 32], strides = [1, 1]} : vector<32x224xbf16> to vector<32x32xbf16>
    %69 = vector.extract_strided_slice %66 {offsets = [0, 64], sizes = [32, 32], strides = [1, 1]} : vector<32x224xbf16> to vector<32x32xbf16>
    %70 = vector.extract_strided_slice %66 {offsets = [0, 96], sizes = [32, 32], strides = [1, 1]} : vector<32x224xbf16> to vector<32x32xbf16>
    %71 = vector.extract_strided_slice %66 {offsets = [0, 128], sizes = [32, 32], strides = [1, 1]} : vector<32x224xbf16> to vector<32x32xbf16>
    %72 = vector.extract_strided_slice %66 {offsets = [0, 160], sizes = [32, 32], strides = [1, 1]} : vector<32x224xbf16> to vector<32x32xbf16>
    %73 = vector.extract_strided_slice %66 {offsets = [0, 192], sizes = [32, 32], strides = [1, 1]} : vector<32x224xbf16> to vector<32x32xbf16>
    %74 = tpu.concatenate %67, %68, %69, %70, %71, %72, %73 in 0 : vector<32x32xbf16>, vector<32x32xbf16>, vector<32x32xbf16>, vector<32x32xbf16>, vector<32x32xbf16>, vector<32x32xbf16>, vector<32x32xbf16> -> vector<224x32xbf16>
    %c0_33 = arith.constant 0 : index
    %c0_34 = arith.constant 0 : index
    %75 = vector.load %arg0[%c0_33, %c0_34] : memref<32x224xbf16, #tpu.memory_space<vmem>>, vector<32x224xbf16>
    %cst_35 = arith.constant dense<0.000000e+00> : vector<32x32xf32>
    %76 = tpu.matmul %75, %74, %cst_35 {dimension_numbers = #tpu.dot_dimension_numbers<[1], [0], [0], [1], [0, 0, 1, 1], [], []>} : vector<32x224xbf16>, vector<224x32xbf16>, vector<32x32xf32> -> vector<32x32xf32>
    %c3_36 = arith.constant 3 : index
    %c0_37 = arith.constant 0 : index
    %c0_38 = arith.constant 0 : index
    %77 = vector.load %arg3[%c3_36, %c0_37, %c0_38] : memref<4x1x32xf32, #tpu.memory_space<vmem>>, vector<1x1x32xf32>
    %78 = vector.shape_cast %77 : vector<1x1x32xf32> to vector<1x32xf32>
    %79 = vector.broadcast %78 : vector<1x32xf32> to vector<32x32xf32>
    %80 = arith.addf %76, %79 : vector<32x32xf32>
    %81 = vector.extract_strided_slice %80 {offsets = [0, 0], sizes = [32, 1], strides = [1, 1]} : vector<32x32xf32> to vector<32x1xf32>
    %82 = math.tanh %81 : vector<32x1xf32>
    %c0_39 = arith.constant 0 : index
    %c0_40 = arith.constant 0 : index
    %83 = vector.load %arg4[%c0_39, %c0_40] : memref<32x1xf32, #tpu.memory_space<vmem>>, vector<32x1xf32>
    tpu.vector_store %arg4[%c0_39, %c0_40], %82 {strides = array<i32>} : memref<32x1xf32, #tpu.memory_space<vmem>>, vector<32x1xf32>,
    return
  }
}

</mosaic_0001>

<bundles_post_ra>
// kernel: apmodel2_forward.1
= control target key start
LH: loop header
LB: loop body
LE: loop exit
PB: predicated region body
PF: predicated region fallthrough
CT: control target
= control target key end

     0   :  { %9 = vsyncpa [#allocation3], 0  ;;  %s918_s15 = smov [#allocation2]   ;;  %s1156_s0 = inlined_call_operand.vmem [shape: bf16[32,224], index: 0, kind: input, shape index: {}]   ;;  %s1157_s1 = inlined_call_operand.vmem [shape: f32[32,1], index: 1, kind: input, shape index: {}]   ;;  %s1158_s2 = inlined_call_operand.hbm [shape: f32[4,32,224], index: 2, kind: input, shape index: {}]   ;;  %s1159_s3 = inlined_call_operand.vmem [shape: f32[4,1,32], index: 3, kind: input, shape index: {}]   ;;  %s1160_s4 = inlined_call_operand.vmem [shape: f32[32,1], index: 4, kind: output, shape index: {}]  }
   0x1   :  { %s19_s16 = sshll.u32 %s918_s15, 4  ;;  %s20_s16 = int_to_ptr.vmem [resolvable:$true] %s19_s16 }
   0x2   :  { %s904_s17 = scalar_lea.vmem %s20_s16, 4096  ;;  %p909_p1 = scmp.lt.s32.totalorder %s20_s16, %s20_s16 }
   0x3   :  { %p905_p0 = scmp.ne.s32.totalorder %s20_s16, %s904_s17  ;;  %p910_p2 = scmp.lt.s32.totalorder %s904_s17, %s904_s17 }
   0x5   :  { %p911_p3 = por %p910_p2, %p909_p1 }
   0x7   :  { %p912_p4 = pnand %p911_p3, %p905_p0 }
   0x9   :  { %915 = shalt.err (!%p912_p4)
}
   0xa   :  { %s919_s18 = smov 256   ;;  %s920_s19 = smov 16  }
   0xb   :  { %25 = dma.hbm_to_vmem [thread:$0]  %s1158_s2, 4096, %s20_s16, [#allocation3], %s919_s18, %s919_s18, %s920_s19  }
   0xc   :  { %916 = dma.done.wait [#allocation3], 4096  }
   0xd   :  { %917 = vsyncadd [#allocation3], 4294963200  ;;  %v921_v0 = vmov 0   ;;  %v34_v1 = vld [vmem:[%s1157_s1 + $0x10] sm:$0xff]  ;;  %v32_v2 = vld [vmem:[%s1157_s1] sm:$0xff]  ;;  %v58_v5 = vlaneseq  ;;  %s922_s29 = smov 32  }
   0xe   :  { %881 = vset.pattern.permute.xlu1 %v921_v0  ;;  %880 = vset.pattern.permute.xlu0 %v921_v0  ;;  %v35_v3 = vld [vmem:[%s1157_s1 + $0x18] sm:$0xff]  ;;  %v33_v4 = vld [vmem:[%s1157_s1 + $0x8] sm:$0xff]  ;;  %s923_s1 = smov 64   ;;  %s924_s30 = smov 96   ;;  %vm143_vm0 = vcmask 785408   ;;  %v210_v30 = vld [vmem:[#allocation2 + $0x70] sm:$0xff] }
   0xf   :  { %150 = vmatprep.subr.bf16.mxu0 %v921_v0  ;;  %49 = vperm.xlu0 %880, %v34_v1   ;;  %v59_v6 = vshrl.u32 %v58_v5, 7  ;;  %v36_v8 = vld [vmem:[#allocation2] ss:$8 sm:$0x3]  ;;  %v982_v28 = vld [vmem:[%s1156_s0 + $0x4] ss:$8 sps:$4 sm:$0xff]  }
  0x10   :  { %39 = vperm.xlu1 %881, %v32_v2   ;;  %846 = vmatprep.mubr.msk.bf16.mxu0 %vm143_vm0, %v982_v28  ;;  %v211_v29 = vld [vmem:[#allocation2 + $0x78] sm:$0xff]  ;;  %v209_v31 = vld [vmem:[#allocation2 + $0x68] sm:$0xff]  ;;  %v208_v45 = vld [vmem:[#allocation2 + $0x60] sm:$0xff]  ;;  %v925_v50 = vmov 0.0   ;;  %vm212_vm1 = vcmask 261120   ;;  %vm831_vm2 = vcmask 7168  }
  0x11   :  { %v60_v7 = vsub.s32 0, %v59_v6  ;;  %v64_v20 = vsub.s32 1, %v59_v6  ;;  %249 = vmatprep.subr.mxu1 %v211_v29  ;;  %v1002_v42 = vld [vmem:[%s1156_s0] ss:$8 sps:$4 sm:$0xff]   ;;  %v1007_v43 = vld [vmem:[%s1156_s0 + $0x14] ss:$8 sps:$4 sm:$0xff]   ;;  %289 = vmatprep.mubr.f32.mxu1 %v925_v50 }
  0x12   :  { %250 = vmatpush1.msra.mxu1 %v210_v30  ;;  %v1015_v44 = vld [vmem:[%s1156_s0 + $0x10] ss:$8 sps:$4 sm:$0xff]   ;;  %v205_v48 = vld [vmem:[#allocation2 + $0x48] sm:$0xff]  ;;  %v204_v49 = vld [vmem:[#allocation2 + $0x40] sm:$0xff] }
  0x13   :  { %54 = vperm.xlu0 %880, %v35_v3   ;;  %v61_v11 = vrot.slane %v36_v8, %v60_v7  ;;  %v65_v21 = vrot.slane %v36_v8, %v64_v20  ;;  %251 = vmatprep.subr.mxu1 %v209_v31  ;;  %v207_v46 = vld [vmem:[#allocation2 + $0x58] sm:$0xff]  ;;  %v206_v47 = vld [vmem:[#allocation2 + $0x50] sm:$0xff]  ;;  %v841_v51 = vld [vmem:[%s1159_s3] ss:$0 sm:$0xff] }
  0x14   :  { %44 = vperm.xlu1 %881, %v33_v4   ;;  %252 = vmatpush1.msra.mxu1 %v208_v45  ;;  %v420_v29 = vld [vmem:[#allocation2 + $0xb0] sm:$0xff]  ;;  %v419_v30 = vld [vmem:[#allocation2 + $0xa8] sm:$0xff]  ;;  %v418_v31 = vld [vmem:[#allocation2 + $0xa0] sm:$0xff] }
  0x15   :  { %253 = vmatprep.subr.mxu1 %v207_v46 }
  0x16   :  { %254 = vmatpush1.msra.mxu1 %v206_v47 }
  0x17   :  { %255 = vmatprep.subr.mxu1 %v205_v48 }
  0x18   :  { %256 = vmatpush1.msra.mxu1 %v204_v49 }
  0x19   :  { %360 = vmatprep.subr.bf16.mxu1 %v921_v0 }
  0x8a   :  { %v50_v9 = vpop.permute.xlu0 %49 }
  0x8b   :  { %v40_v10 = vpop.permute.xlu1 %39  ;;  %v72_v15 = vmul.f32 %v61_v11, %v50_v9  ;;  %v73_v25 = vmul.f32 %v65_v21, %v50_v9 }
  0x8c   :  { %v68_v12 = vmul.f32 %v61_v11, %v40_v10  ;;  %v69_v22 = vmul.f32 %v65_v21, %v40_v10 }
  0x8e   :  { %v55_v13 = vpop.permute.xlu0 %54 }
  0x8f   :  { %v45_v14 = vpop.permute.xlu1 %44  ;;  %v74_v16 = vmul.f32 %v61_v11, %v55_v13  ;;  %v75_v23 = vmul.f32 %v65_v21, %v55_v13 }
  0x90   :  { %v70_v17 = vmul.f32 %v61_v11, %v45_v14  ;;  %v71_v24 = vmul.f32 %v65_v21, %v45_v14 }
  0x91   :  { %v78_v18 = vpack.c.bf16 %v74_v16, %v72_v15  ;;  %v79_v26 = vpack.c.bf16 %v75_v23, %v73_v25 }
  0x92   :  { %v76_v19 = vpack.c.bf16 %v70_v17, %v68_v12  ;;  %v77_v27 = vpack.c.bf16 %v71_v24, %v69_v22 }
  0x93   :  { %96 = vrot.lane.b32.xlu0 %v78_v18, %s922_s29 }
  0x94   :  { %94 = vrot.lane.b32.xlu1 %v76_v19, %s922_s29 }
  0x97   :  { %90 = vrot.lane.b32.xlu0 %v78_v18, %s923_s1 }
  0x98   :  { %88 = vrot.lane.b32.xlu1 %v76_v19, %s923_s1 }
  0x9b   :  { %84 = vrot.lane.b32.xlu0 %v78_v18, %s924_s30 }
  0x9c   :  { %82 = vrot.lane.b32.xlu1 %v76_v19, %s924_s30 }
  0x9f   :  { %110 = vrot.lane.b32.xlu0 %v79_v26, %s923_s1 }
  0xa0   :  { %108 = vrot.lane.b32.xlu1 %v77_v27, %s923_s1 }
  0xa3   :  { %104 = vrot.lane.b32.xlu0 %v79_v26, %s924_s30 }
  0xa4   :  { %102 = vrot.lane.b32.xlu1 %v77_v27, %s924_s30 }
 0x105   :  { %v97_v32 = vpop.permute.xlu0 %96 }
 0x106   :  { %151 = vmatpush1.bf16.msra.mxu0 %v97_v32  ;;  %v95_v33 = vpop.permute.xlu1 %94  ;;  %v417_v32 = vld [vmem:[#allocation2 + $0x98] sm:$0xff] }
 0x107   :  { %152 = vmatprep.subr.bf16.mxu0 %v921_v0 }
 0x109   :  { %v91_v34 = vpop.permute.xlu0 %90 }
 0x10a   :  { %153 = vmatpush1.bf16.msra.mxu0 %v95_v33  ;;  %v89_v35 = vpop.permute.xlu1 %88  ;;  %v416_v33 = vld [vmem:[#allocation2 + $0x90] sm:$0xff] }
 0x10b   :  { %154 = vmatprep.subr.bf16.mxu0 %v921_v0 }
 0x10d   :  { %v85_v36 = vpop.permute.xlu0 %84 }
 0x10e   :  { %155 = vmatpush1.bf16.msra.mxu0 %v91_v34  ;;  %v83_v37 = vpop.permute.xlu1 %82  ;;  %v415_v34 = vld [vmem:[#allocation2 + $0x88] sm:$0xff] }
 0x10f   :  { %156 = vmatprep.subr.bf16.mxu0 %v921_v0 }
 0x111   :  { %v111_v38 = vpop.permute.xlu0 %110 }
 0x112   :  { %157 = vmatpush1.bf16.msra.mxu0 %v89_v35  ;;  %v109_v39 = vpop.permute.xlu1 %108  ;;  %v414_v35 = vld [vmem:[#allocation2 + $0x80] sm:$0xff] }
 0x113   :  { %158 = vmatprep.subr.bf16.mxu0 %v921_v0 }
 0x115   :  { %v105_v40 = vpop.permute.xlu0 %104 }
 0x116   :  { %159 = vmatpush1.bf16.msra.mxu0 %v85_v36  ;;  %v103_v41 = vpop.permute.xlu1 %102  ;;  %v853_v36 = vld [vmem:[%s1159_s3 + $0x1] ss:$0 sm:$0xff] }
 0x117   :  { %160 = vmatprep.subr.bf16.mxu0 %v921_v0 }
 0x11a   :  { %161 = vmatpush1.bf16.msra.mxu0 %v83_v37 }
 0x11b   :  { %162 = vmatprep.subr.bf16.mxu0 %v921_v0 }
 0x11e   :  { %163 = vmatpush1.bf16.msra.mxu0 %v78_v18 }
 0x11f   :  { %164 = vmatprep.subr.bf16.mxu0 %v921_v0 }
 0x122   :  { %165 = vmatpush1.bf16.msra.mxu0 %v76_v19 }
 0x123   :  { %170 = vmatprep.subr.bf16.mxu0 %v921_v0 }
 0x126   :  { %171 = vmatpush2.bf16.msra.mxu0 %v111_v38 }
 0x127   :  { %172 = vmatprep.subr.bf16.mxu0 %v921_v0 }
 0x12a   :  { %173 = vmatpush2.bf16.msra.mxu0 %v109_v39 }
 0x12b   :  { %174 = vmatprep.subr.bf16.mxu0 %v921_v0 }
 0x12e   :  { %175 = vmatpush2.bf16.msra.mxu0 %v105_v40 }
 0x12f   :  { %176 = vmatprep.subr.bf16.mxu0 %v921_v0 }
 0x132   :  { %177 = vmatpush2.bf16.msra.mxu0 %v103_v41 }
 0x133   :  { %178 = vmatprep.subr.bf16.mxu0 %v921_v0 }
 0x136   :  { %179 = vmatpush2.bf16.msra.mxu0 %v79_v26 }
 0x137   :  { %180 = vmatprep.subr.bf16.mxu0 %v921_v0 }
 0x13a   :  { %181 = vmatpush2.bf16.msra.mxu0 %v77_v27  ;;  %v421_v27 = vld [vmem:[#allocation2 + $0xb8] sm:$0xff] }
 0x13d   :  { %183 = vmatmul.mubr.bf16.vlgmr.msra.gmra.mxu0 %v1002_v42 }
 0x13e   :  { %847 = vmatprep.mubr.msk.bf16.mxu0 %vm143_vm0, %v1007_v43 }
 0x145   :  { %191 = vmatmul.mubr.bf16.gmra.mxu0 %v1015_v44 }
 0x146   :  { %707 = vmatprep.mubr.f32.mxu0 %v925_v50 }
 0x1fd   :  { %v184_v52 = vpop.f32.mrf.mxu0 }
 0x1fe   :  { %v185_v53 = vadd.f32 %v841_v51, %v184_v52 }
 0x1ff   :  { %v186_v54 = vpop.f32.mrf.mxu0 }
 0x200   :  { %v199_v55 = vmax.f32 %v185_v53, 0.0 }
 0x201   :  { %v187_v56 = vpop.f32.mrf.mxu0 }
 0x202   :  { %v188_v57 = vadd.f32 %v841_v51, %v187_v56  ;;  %848 = vmatmul.mubr.msk.f32.vlgmr.msra.gmra.mxu1 %vm212_vm1, %v199_v55 }
 0x203   :  { %v189_v58 = vpop.f32.mrf.mxu0  ;;  %295 = vmatprep.mubr.f32.mxu1 %v925_v50 }
 0x204   :  { %v200_v59 = vmax.f32 %v188_v57, 0.0 }
 0x205   :  { %v192_v60 = vpop.f32.mrf.mxu0 }
 0x206   :  { %v193_v61 = vadd.f32 %v841_v51, %v192_v60  ;;  %849 = vmatmul.mubr.msk.f32.gmra.mxu1 %vm212_vm1, %v200_v59 }
 0x207   :  { %v194_v62 = vpop.f32.mrf.mxu0  ;;  %301 = vmatprep.mubr.f32.mxu1 %v925_v50 }
 0x208   :  { %v201_v63 = vmax.f32 %v193_v61, 0.0 }
 0x209   :  { %v195_v1 = vpop.f32.mrf.mxu0 }
 0x20a   :  { %v196_v2 = vadd.f32 %v841_v51, %v195_v1  ;;  %850 = vmatmul.mubr.msk.f32.gmra.mxu1 %vm212_vm1, %v201_v63 }
 0x20b   :  { %v197_v3 = vpop.f32.mrf.mxu0  ;;  %307 = vmatprep.mubr.f32.mxu1 %v925_v50 }
 0x20c   :  { %v202_v4 = vmax.f32 %v196_v2, 0.0 }
 0x20e   :  { %851 = vmatmul.mubr.msk.f32.gmra.mxu1 %vm212_vm1, %v202_v4 }
 0x20f   :  { %854 = vmatprep.mubr.msk.bf16.mxu1 %vm143_vm0, %v982_v28 }
 0x2c2   :  { %v291_v5 = vpop.f32.mrf.mxu1 }
 0x2c4   :  { %v293_v6 = vpop.f32.mrf.mxu1 }
 0x2c6   :  { %v297_v7 = vpop.f32.mrf.mxu1 }
 0x2c7   :  { %v314_v8 = vpack.c.bf16 %v297_v7, %v291_v5  ;;  %v629_v7 = vld [vmem:[#allocation2 + $0xf0] sm:$0xff] }
 0x2c8   :  { %v299_v9 = vpop.f32.mrf.mxu1 }
 0x2c9   :  { %332 = vrot.lane.b32.xlu1 %v314_v8, %s922_s29  ;;  %v315_v14 = vpack.c.bf16 %v299_v9, %v293_v6  ;;  %v630_v6 = vld [vmem:[#allocation2 + $0xf8] sm:$0xff]  ;;  %v627_v9 = vld [vmem:[#allocation2 + $0xe0] sm:$0xff] }
 0x2ca   :  { %v303_v10 = vpop.f32.mrf.mxu1  ;;  %667 = vmatprep.subr.mxu0 %v630_v6 }
 0x2cb   :  { %668 = vmatpush1.msra.mxu0 %v629_v7 }
 0x2cc   :  { %v305_v11 = vpop.f32.mrf.mxu1 }
 0x2cd   :  { %326 = vrot.lane.b32.xlu1 %v314_v8, %s923_s1 }
 0x2ce   :  { %v309_v12 = vpop.f32.mrf.mxu1 }
 0x2cf   :  { %v316_v13 = vpack.c.bf16 %v309_v12, %v303_v10  ;;  %v626_v10 = vld [vmem:[#allocation2 + $0xd8] sm:$0xff] }
 0x2d0   :  { %v311_v15 = vpop.f32.mrf.mxu1 }
 0x2d1   :  { %320 = vrot.lane.b32.xlu1 %v314_v8, %s924_s30  ;;  %334 = vrot.lane.b32.xlu0 %v316_v13, %s922_s29  ;;  %v317_v16 = vpack.c.bf16 %v311_v15, %v305_v11  ;;  %v625_v11 = vld [vmem:[#allocation2 + $0xd0] sm:$0xff] }
 0x2d5   :  { %346 = vrot.lane.b32.xlu1 %v315_v14, %s923_s1  ;;  %328 = vrot.lane.b32.xlu0 %v316_v13, %s923_s1 }
 0x2d9   :  { %340 = vrot.lane.b32.xlu1 %v315_v14, %s924_s30  ;;  %322 = vrot.lane.b32.xlu0 %v316_v13, %s924_s30 }
 0x2dd   :  { %348 = vrot.lane.b32.xlu0 %v317_v16, %s923_s1 }
 0x2e1   :  { %342 = vrot.lane.b32.xlu0 %v317_v16, %s924_s30 }
 0x33b   :  { %v333_v18 = vpop.permute.xlu1 %332 }
 0x33f   :  { %v327_v20 = vpop.permute.xlu1 %326 }
 0x343   :  { %v335_v17 = vpop.permute.xlu0 %334  ;;  %v321_v22 = vpop.permute.xlu1 %320 }
 0x344   :  { %361 = vmatpush1.bf16.msra.mxu1 %v335_v17 }
 0x345   :  { %362 = vmatprep.subr.bf16.mxu1 %v921_v0 }
 0x347   :  { %v329_v19 = vpop.permute.xlu0 %328  ;;  %v347_v24 = vpop.permute.xlu1 %346 }
 0x348   :  { %363 = vmatpush1.bf16.msra.mxu1 %v333_v18 }
 0x349   :  { %364 = vmatprep.subr.bf16.mxu1 %v921_v0 }
 0x34b   :  { %v323_v21 = vpop.permute.xlu0 %322  ;;  %v341_v26 = vpop.permute.xlu1 %340 }
 0x34c   :  { %365 = vmatpush1.bf16.msra.mxu1 %v329_v19 }
 0x34d   :  { %366 = vmatprep.subr.bf16.mxu1 %v921_v0 }
 0x34f   :  { %v349_v23 = vpop.permute.xlu0 %348 }
 0x350   :  { %367 = vmatpush1.bf16.msra.mxu1 %v327_v20 }
 0x351   :  { %368 = vmatprep.subr.bf16.mxu1 %v921_v0 }
 0x353   :  { %v343_v25 = vpop.permute.xlu0 %342 }
 0x354   :  { %369 = vmatpush1.bf16.msra.mxu1 %v323_v21 }
 0x355   :  { %370 = vmatprep.subr.bf16.mxu1 %v921_v0 }
 0x358   :  { %371 = vmatpush1.bf16.msra.mxu1 %v321_v22  ;;  %v624_v22 = vld [vmem:[#allocation2 + $0xc8] sm:$0xff] }
 0x359   :  { %372 = vmatprep.subr.bf16.mxu1 %v921_v0 }
 0x35c   :  { %373 = vmatpush1.bf16.msra.mxu1 %v316_v13 }
 0x35d   :  { %374 = vmatprep.subr.bf16.mxu1 %v921_v0 }
 0x360   :  { %375 = vmatpush1.bf16.msra.mxu1 %v314_v8  ;;  %v628_v8 = vld [vmem:[#allocation2 + $0xe8] sm:$0xff] }
 0x361   :  { %380 = vmatprep.subr.bf16.mxu1 %v921_v0  ;;  %669 = vmatprep.subr.mxu0 %v628_v8 }
 0x362   :  { %670 = vmatpush1.msra.mxu0 %v627_v9 }
 0x363   :  { %671 = vmatprep.subr.mxu0 %v626_v10 }
 0x364   :  { %381 = vmatpush2.bf16.msra.mxu1 %v349_v23  ;;  %672 = vmatpush1.msra.mxu0 %v625_v11  ;;  %v623_v23 = vld [vmem:[#allocation2 + $0xc0] sm:$0xff] }
 0x365   :  { %382 = vmatprep.subr.bf16.mxu1 %v921_v0  ;;  %673 = vmatprep.subr.mxu0 %v624_v22 }
 0x366   :  { %674 = vmatpush1.msra.mxu0 %v623_v23 }
 0x367   :  { %778 = vmatprep.subr.bf16.mxu0 %v921_v0 }
 0x368   :  { %383 = vmatpush2.bf16.msra.mxu1 %v347_v24  ;;  %v861_v24 = vld [vmem:[%s1159_s3 + $0x2] ss:$0 sm:$0xff] }
 0x369   :  { %384 = vmatprep.subr.bf16.mxu1 %v921_v0 }
 0x36c   :  { %385 = vmatpush2.bf16.msra.mxu1 %v343_v25 }
 0x36d   :  { %386 = vmatprep.subr.bf16.mxu1 %v921_v0 }
 0x370   :  { %387 = vmatpush2.bf16.msra.mxu1 %v341_v26 }
 0x371   :  { %388 = vmatprep.subr.bf16.mxu1 %v921_v0 }
 0x374   :  { %389 = vmatpush2.bf16.msra.mxu1 %v317_v16 }
 0x375   :  { %390 = vmatprep.subr.bf16.mxu1 %v921_v0 }
 0x378   :  { %391 = vmatpush2.bf16.msra.mxu1 %v315_v14 }
 0x379   :  { %458 = vmatprep.subr.mxu1 %v421_v27 }
 0x37b   :  { %393 = vmatmul.mubr.bf16.vlgmr.msra.gmra.mxu1 %v1002_v42 }
 0x37c   :  { %855 = vmatprep.mubr.msk.bf16.mxu1 %vm143_vm0, %v1007_v43  ;;  %459 = vmatpush1.msra.mxu1 %v420_v29 }
 0x37d   :  { %460 = vmatprep.subr.mxu1 %v419_v30 }
 0x37e   :  { %461 = vmatpush1.msra.mxu1 %v418_v31 }
 0x37f   :  { %462 = vmatprep.subr.mxu1 %v417_v32 }
 0x380   :  { %463 = vmatpush1.msra.mxu1 %v416_v33 }
 0x381   :  { %464 = vmatprep.subr.mxu1 %v415_v34 }
 0x382   :  { %465 = vmatpush1.msra.mxu1 %v414_v35 }
 0x383   :  { %401 = vmatmul.mubr.bf16.gmra.mxu1 %v1015_v44  ;;  %569 = vmatprep.subr.bf16.mxu1 %v921_v0 }
 0x384   :  { %498 = vmatprep.mubr.f32.mxu1 %v925_v50 }
 0x43b   :  { %v394_v37 = vpop.f32.mrf.mxu1 }
 0x43c   :  { %v395_v38 = vadd.f32 %v853_v36, %v394_v37 }
 0x43d   :  { %v396_v39 = vpop.f32.mrf.mxu1 }
 0x43e   :  { %v409_v40 = vmax.f32 %v395_v38, 0.0 }
 0x43f   :  { %v397_v41 = vpop.f32.mrf.mxu1 }
 0x440   :  { %v398_v45 = vadd.f32 %v853_v36, %v397_v41  ;;  %856 = vmatmul.mubr.msk.f32.vlgmr.msra.gmra.mxu1 %vm212_vm1, %v409_v40 }
 0x441   :  { %v399_v46 = vpop.f32.mrf.mxu1  ;;  %504 = vmatprep.mubr.f32.mxu1 %v925_v50 }
 0x442   :  { %v410_v47 = vmax.f32 %v398_v45, 0.0 }
 0x443   :  { %v402_v48 = vpop.f32.mrf.mxu1 }
 0x444   :  { %v403_v49 = vadd.f32 %v853_v36, %v402_v48  ;;  %857 = vmatmul.mubr.msk.f32.gmra.mxu1 %vm212_vm1, %v410_v47 }
 0x445   :  { %v404_v51 = vpop.f32.mrf.mxu1  ;;  %510 = vmatprep.mubr.f32.mxu1 %v925_v50 }
 0x446   :  { %v411_v52 = vmax.f32 %v403_v49, 0.0 }
 0x447   :  { %v405_v53 = vpop.f32.mrf.mxu1 }
 0x448   :  { %v406_v54 = vadd.f32 %v853_v36, %v405_v53  ;;  %858 = vmatmul.mubr.msk.f32.gmra.mxu1 %vm212_vm1, %v411_v52 }
 0x449   :  { %v407_v55 = vpop.f32.mrf.mxu1  ;;  %516 = vmatprep.mubr.f32.mxu1 %v925_v50 }
 0x44a   :  { %v412_v56 = vmax.f32 %v406_v54, 0.0 }
 0x44c   :  { %859 = vmatmul.mubr.msk.f32.gmra.mxu1 %vm212_vm1, %v412_v56 }
 0x44d   :  { %862 = vmatprep.mubr.msk.bf16.mxu1 %vm143_vm0, %v982_v28 }
 0x500   :  { %v500_v57 = vpop.f32.mrf.mxu1 }
 0x502   :  { %v502_v58 = vpop.f32.mrf.mxu1 }
 0x504   :  { %v506_v59 = vpop.f32.mrf.mxu1 }
 0x505   :  { %v523_v60 = vpack.c.bf16 %v506_v59, %v500_v57 }
 0x506   :  { %v508_v61 = vpop.f32.mrf.mxu1 }
 0x507   :  { %541 = vrot.lane.b32.xlu1 %v523_v60, %s922_s29  ;;  %v524_v3 = vpack.c.bf16 %v508_v61, %v502_v58 }
 0x508   :  { %v512_v62 = vpop.f32.mrf.mxu1 }
 0x50a   :  { %v514_v63 = vpop.f32.mrf.mxu1 }
 0x50b   :  { %535 = vrot.lane.b32.xlu1 %v523_v60, %s923_s1 }
 0x50c   :  { %v518_v1 = vpop.f32.mrf.mxu1 }
 0x50d   :  { %v525_v2 = vpack.c.bf16 %v518_v1, %v512_v62 }
 0x50e   :  { %v520_v4 = vpop.f32.mrf.mxu1 }
 0x50f   :  { %529 = vrot.lane.b32.xlu1 %v523_v60, %s924_s30  ;;  %543 = vrot.lane.b32.xlu0 %v525_v2, %s922_s29  ;;  %v526_v5 = vpack.c.bf16 %v520_v4, %v514_v63 }
 0x513   :  { %555 = vrot.lane.b32.xlu1 %v524_v3, %s923_s1  ;;  %537 = vrot.lane.b32.xlu0 %v525_v2, %s923_s1 }
 0x517   :  { %549 = vrot.lane.b32.xlu1 %v524_v3, %s924_s30  ;;  %531 = vrot.lane.b32.xlu0 %v525_v2, %s924_s30 }
 0x51b   :  { %557 = vrot.lane.b32.xlu0 %v526_v5, %s923_s1 }
 0x51f   :  { %551 = vrot.lane.b32.xlu0 %v526_v5, %s924_s30 }
 0x579   :  { %v542_v13 = vpop.permute.xlu1 %541 }
 0x57d   :  { %v536_v15 = vpop.permute.xlu1 %535 }
 0x581   :  { %v544_v12 = vpop.permute.xlu0 %543  ;;  %v530_v17 = vpop.permute.xlu1 %529 }
 0x582   :  { %570 = vmatpush1.bf16.msra.mxu1 %v544_v12 }
 0x583   :  { %571 = vmatprep.subr.bf16.mxu1 %v921_v0 }
 0x585   :  { %v538_v14 = vpop.permute.xlu0 %537  ;;  %v556_v19 = vpop.permute.xlu1 %555 }
 0x586   :  { %572 = vmatpush1.bf16.msra.mxu1 %v542_v13 }
 0x587   :  { %573 = vmatprep.subr.bf16.mxu1 %v921_v0 }
 0x589   :  { %v532_v16 = vpop.permute.xlu0 %531  ;;  %v550_v21 = vpop.permute.xlu1 %549 }
 0x58a   :  { %574 = vmatpush1.bf16.msra.mxu1 %v538_v14 }
 0x58b   :  { %575 = vmatprep.subr.bf16.mxu1 %v921_v0 }
 0x58d   :  { %v558_v18 = vpop.permute.xlu0 %557 }
 0x58e   :  { %576 = vmatpush1.bf16.msra.mxu1 %v536_v15 }
 0x58f   :  { %577 = vmatprep.subr.bf16.mxu1 %v921_v0 }
 0x591   :  { %v552_v20 = vpop.permute.xlu0 %551 }
 0x592   :  { %578 = vmatpush1.bf16.msra.mxu1 %v532_v16 }
 0x593   :  { %579 = vmatprep.subr.bf16.mxu1 %v921_v0 }
 0x596   :  { %580 = vmatpush1.bf16.msra.mxu1 %v530_v17 }
 0x597   :  { %581 = vmatprep.subr.bf16.mxu1 %v921_v0 }
 0x59a   :  { %582 = vmatpush1.bf16.msra.mxu1 %v525_v2 }
 0x59b   :  { %583 = vmatprep.subr.bf16.mxu1 %v921_v0 }
 0x59e   :  { %584 = vmatpush1.bf16.msra.mxu1 %v523_v60 }
 0x59f   :  { %589 = vmatprep.subr.bf16.mxu1 %v921_v0 }
 0x5a2   :  { %590 = vmatpush2.bf16.msra.mxu1 %v558_v18 }
 0x5a3   :  { %591 = vmatprep.subr.bf16.mxu1 %v921_v0 }
 0x5a6   :  { %592 = vmatpush2.bf16.msra.mxu1 %v556_v19 }
 0x5a7   :  { %593 = vmatprep.subr.bf16.mxu1 %v921_v0 }
 0x5aa   :  { %594 = vmatpush2.bf16.msra.mxu1 %v552_v20 }
 0x5ab   :  { %595 = vmatprep.subr.bf16.mxu1 %v921_v0 }
 0x5ae   :  { %596 = vmatpush2.bf16.msra.mxu1 %v550_v21 }
 0x5af   :  { %597 = vmatprep.subr.bf16.mxu1 %v921_v0 }
 0x5b2   :  { %598 = vmatpush2.bf16.msra.mxu1 %v526_v5 }
 0x5b3   :  { %599 = vmatprep.subr.bf16.mxu1 %v921_v0 }
 0x5b6   :  { %600 = vmatpush2.bf16.msra.mxu1 %v524_v3  ;;  %v869_v3 = vld [vmem:[%s1159_s3 + $0x3] ss:$0 sm:$0xff] }
 0x5b9   :  { %602 = vmatmul.mubr.bf16.vlgmr.msra.gmra.mxu1 %v1002_v42 }
 0x5ba   :  { %863 = vmatprep.mubr.msk.bf16.mxu1 %vm143_vm0, %v1007_v43 }
 0x5c1   :  { %610 = vmatmul.mubr.bf16.gmra.mxu1 %v1015_v44 }
 0x679   :  { %v603_v25 = vpop.f32.mrf.mxu1 }
 0x67a   :  { %v604_v26 = vadd.f32 %v861_v24, %v603_v25 }
 0x67b   :  { %v605_v27 = vpop.f32.mrf.mxu1 }
 0x67c   :  { %v618_v29 = vmax.f32 %v604_v26, 0.0 }
 0x67d   :  { %v606_v30 = vpop.f32.mrf.mxu1 }
 0x67e   :  { %v607_v31 = vadd.f32 %v861_v24, %v606_v30  ;;  %864 = vmatmul.mubr.msk.f32.vlgmr.msra.gmra.mxu0 %vm212_vm1, %v618_v29 }
 0x67f   :  { %v608_v32 = vpop.f32.mrf.mxu1  ;;  %713 = vmatprep.mubr.f32.mxu0 %v925_v50 }
 0x680   :  { %v619_v33 = vmax.f32 %v607_v31, 0.0 }
 0x681   :  { %v611_v34 = vpop.f32.mrf.mxu1 }
 0x682   :  { %v612_v35 = vadd.f32 %v861_v24, %v611_v34  ;;  %865 = vmatmul.mubr.msk.f32.gmra.mxu0 %vm212_vm1, %v619_v33 }
 0x683   :  { %v613_v36 = vpop.f32.mrf.mxu1  ;;  %719 = vmatprep.mubr.f32.mxu0 %v925_v50 }
 0x684   :  { %v620_v37 = vmax.f32 %v612_v35, 0.0 }
 0x685   :  { %v614_v38 = vpop.f32.mrf.mxu1 }
 0x686   :  { %v615_v39 = vadd.f32 %v861_v24, %v614_v38  ;;  %866 = vmatmul.mubr.msk.f32.gmra.mxu0 %vm212_vm1, %v620_v37 }
 0x687   :  { %v616_v40 = vpop.f32.mrf.mxu1  ;;  %725 = vmatprep.mubr.f32.mxu0 %v925_v50 }
 0x688   :  { %v621_v41 = vmax.f32 %v615_v39, 0.0 }
 0x68a   :  { %867 = vmatmul.mubr.msk.f32.gmra.mxu0 %vm212_vm1, %v621_v41 }
 0x68b   :  { %870 = vmatprep.mubr.msk.bf16.mxu0 %vm143_vm0, %v982_v28 }
 0x73e   :  { %v709_v45 = vpop.f32.mrf.mxu0 }
 0x740   :  { %v711_v46 = vpop.f32.mrf.mxu0 }
 0x742   :  { %v715_v47 = vpop.f32.mrf.mxu0 }
 0x743   :  { %v732_v48 = vpack.c.bf16 %v715_v47, %v709_v45 }
 0x744   :  { %v717_v49 = vpop.f32.mrf.mxu0 }
 0x745   :  { %750 = vrot.lane.b32.xlu1 %v732_v48, %s922_s29  ;;  %v733_v50 = vpack.c.bf16 %v717_v49, %v711_v46 }
 0x746   :  { %v721_v51 = vpop.f32.mrf.mxu0 }
 0x748   :  { %v723_v52 = vpop.f32.mrf.mxu0 }
 0x749   :  { %744 = vrot.lane.b32.xlu1 %v732_v48, %s923_s1 }
 0x74a   :  { %v727_v53 = vpop.f32.mrf.mxu0 }
 0x74b   :  { %v734_v54 = vpack.c.bf16 %v727_v53, %v721_v51 }
 0x74c   :  { %v729_v28 = vpop.f32.mrf.mxu0 }
 0x74d   :  { %738 = vrot.lane.b32.xlu1 %v732_v48, %s924_s30  ;;  %752 = vrot.lane.b32.xlu0 %v734_v54, %s922_s29  ;;  %v735_v55 = vpack.c.bf16 %v729_v28, %v723_v52 }
 0x751   :  { %764 = vrot.lane.b32.xlu1 %v733_v50, %s923_s1  ;;  %746 = vrot.lane.b32.xlu0 %v734_v54, %s923_s1 }
 0x755   :  { %758 = vrot.lane.b32.xlu1 %v733_v50, %s924_s30  ;;  %740 = vrot.lane.b32.xlu0 %v734_v54, %s924_s30 }
 0x759   :  { %766 = vrot.lane.b32.xlu0 %v735_v55, %s923_s1 }
 0x75d   :  { %760 = vrot.lane.b32.xlu0 %v735_v55, %s924_s30 }
 0x7b7   :  { %v751_v57 = vpop.permute.xlu1 %750 }
 0x7bb   :  { %v745_v59 = vpop.permute.xlu1 %744 }
 0x7bf   :  { %v753_v56 = vpop.permute.xlu0 %752  ;;  %v739_v61 = vpop.permute.xlu1 %738 }
 0x7c0   :  { %779 = vmatpush1.bf16.msra.mxu0 %v753_v56 }
 0x7c1   :  { %780 = vmatprep.subr.bf16.mxu0 %v921_v0 }
 0x7c3   :  { %v747_v58 = vpop.permute.xlu0 %746  ;;  %v765_v63 = vpop.permute.xlu1 %764 }
 0x7c4   :  { %781 = vmatpush1.bf16.msra.mxu0 %v751_v57 }
 0x7c5   :  { %782 = vmatprep.subr.bf16.mxu0 %v921_v0 }
 0x7c7   :  { %v741_v60 = vpop.permute.xlu0 %740  ;;  %v759_v2 = vpop.permute.xlu1 %758 }
 0x7c8   :  { %783 = vmatpush1.bf16.msra.mxu0 %v747_v58 }
 0x7c9   :  { %784 = vmatprep.subr.bf16.mxu0 %v921_v0 }
 0x7cb   :  { %v767_v62 = vpop.permute.xlu0 %766 }
 0x7cc   :  { %785 = vmatpush1.bf16.msra.mxu0 %v745_v59 }
 0x7cd   :  { %786 = vmatprep.subr.bf16.mxu0 %v921_v0 }
 0x7cf   :  { %v761_v1 = vpop.permute.xlu0 %760 }
 0x7d0   :  { %787 = vmatpush1.bf16.msra.mxu0 %v741_v60 }
 0x7d1   :  { %788 = vmatprep.subr.bf16.mxu0 %v921_v0 }
 0x7d4   :  { %789 = vmatpush1.bf16.msra.mxu0 %v739_v61 }
 0x7d5   :  { %790 = vmatprep.subr.bf16.mxu0 %v921_v0 }
 0x7d8   :  { %791 = vmatpush1.bf16.msra.mxu0 %v734_v54 }
 0x7d9   :  { %792 = vmatprep.subr.bf16.mxu0 %v921_v0 }
 0x7dc   :  { %793 = vmatpush1.bf16.msra.mxu0 %v732_v48 }
 0x7dd   :  { %798 = vmatprep.subr.bf16.mxu0 %v921_v0 }
 0x7e0   :  { %799 = vmatpush2.bf16.msra.mxu0 %v767_v62 }
 0x7e1   :  { %800 = vmatprep.subr.bf16.mxu0 %v921_v0 }
 0x7e4   :  { %801 = vmatpush2.bf16.msra.mxu0 %v765_v63 }
 0x7e5   :  { %802 = vmatprep.subr.bf16.mxu0 %v921_v0 }
 0x7e8   :  { %803 = vmatpush2.bf16.msra.mxu0 %v761_v1 }
 0x7e9   :  { %804 = vmatprep.subr.bf16.mxu0 %v921_v0 }
 0x7ec   :  { %805 = vmatpush2.bf16.msra.mxu0 %v759_v2 }
 0x7ed   :  { %806 = vmatprep.subr.bf16.mxu0 %v921_v0 }
 0x7f0   :  { %807 = vmatpush2.bf16.msra.mxu0 %v735_v55 }
 0x7f1   :  { %808 = vmatprep.subr.bf16.mxu0 %v921_v0 }
 0x7f4   :  { %809 = vmatpush2.bf16.msra.mxu0 %v733_v50 }
 0x7f7   :  { %811 = vmatmul.mubr.bf16.vlgmr.msra.gmra.mxu0 %v1002_v42 }
 0x7f8   :  { %871 = vmatprep.mubr.msk.bf16.mxu0 %vm143_vm0, %v1007_v43 }
 0x7ff   :  { %819 = vmatmul.mubr.bf16.gmra.mxu0 %v1015_v44 }
 0x8b7   :  { %v812_v4 = vpop.f32.mrf.mxu0 }
 0x8b8   :  { %v813_v5 = vadd.f32 %v869_v3, %v812_v4 }
 0x8b9   :  { %v814_v6 = vpop.f32.mrf.mxu0 }
 0x8ba   :  { %888 = vtanh.f32 %v813_v5 }
 0x8bb   :  { %v815_v7 = vpop.f32.mrf.mxu0 }
 0x8bc   :  { %v816_v8 = vadd.f32 %v869_v3, %v815_v7 }
 0x8bd   :  { %v817_v9 = vpop.f32.mrf.mxu0 }
 0x8be   :  { %890 = vtanh.f32 %v816_v8 }
 0x8bf   :  { %v820_v0 = vpop.f32.mrf.mxu0 }
 0x8c0   :  { %v821_v10 = vadd.f32 %v869_v3, %v820_v0 }
 0x8c1   :  { %v822_v42 = vpop.f32.mrf.mxu0 }
 0x8c2   :  { %892 = vtanh.f32 %v821_v10 }
 0x8c3   :  { %v823_v11 = vpop.f32.mrf.mxu0 }
 0x8c4   :  { %v824_v43 = vadd.f32 %v869_v3, %v823_v11 }
 0x8c5   :  { %v825_v44 = vpop.f32.mrf.mxu0 }
 0x8c6   :  { %894 = vtanh.f32 %v824_v43 }
 0x8c7   :  { %v889_v12 = vpop.eup %888 }
 0x8c8   :  { %832 = vst.msk [vmem:[%s1160_s4] sm:$0xff] %vm831_vm2, %v889_v12 }
 0x8cb   :  { %v891_v13 = vpop.eup %890 }
 0x8cc   :  { %833 = vst.msk [vmem:[%s1160_s4 + $0x8] sm:$0xff] %vm831_vm2, %v891_v13 }
 0x8cf   :  { %v893_v14 = vpop.eup %892 }
 0x8d0   :  { %834 = vst.msk [vmem:[%s1160_s4 + $0x10] sm:$0xff] %vm831_vm2, %v893_v14 }
 0x8d3   :  { %v895_v15 = vpop.eup %894 }
 0x8d4   :  { %835 = vst.msk [vmem:[%s1160_s4 + $0x18] sm:$0xff] %vm831_vm2, %v895_v15 }
 0x8d5   :  { %840 = vsyncpa [#allocation3], 1 }

</bundles_post_ra>
